<compile_context>
chip_gen: v6e
topology: v6e:2x2x1
jax: 0.10.0
libtpu: 0.0.40
codegen_flags: <defaults>
</compile_context>

<pallas_src>
import numpy as np
import jax
import jax.numpy as jnp
from jax.experimental import pallas as pl
from jax.experimental.pallas import tpu as pltpu

B = 2                       # batch
V = 256                     # synthetic vertex count (real SMPL: 6890 -> pad to 6912)
J = 24                      # SMPL joints
NB = 10                     # shape (beta) coefficients
POSE_FEATS = 9 * (J - 1)    # 207 pose-blend features
NCOEF = NB + POSE_FEATS     # 217 merged blend coefficients
TV = 128                    # vertex lane-tile (multiple of 128); keep >=2 tiles for v7x
assert V % TV == 0 and TV % 128 == 0

# standard SMPL kinematic tree (parent of joint i); root parent unused
KINTREE_PARENTS = [-1, 0, 0, 0, 1, 2, 3, 4, 5, 6, 7, 8, 9, 9, 9,
                   12, 13, 14, 16, 17, 18, 19, 20, 21]


def _tree_levels(parents):
    depth = [0] * len(parents)
    for i in range(1, len(parents)):
        depth[i] = depth[parents[i]] + 1
    return [np.array([i for i, d in enumerate(depth) if d == lvl], np.int32)
            for lvl in range(1, max(depth) + 1)]


TREE_LEVELS = _tree_levels(KINTREE_PARENTS)   # 8 levels of independent joints
PARENTS_NP = np.array(KINTREE_PARENTS, np.int32)
PARENTS_CLAMPED = PARENTS_NP.copy()
PARENTS_CLAMPED[0] = 0


# ----------------------------- Pallas kernel -------------------------------

def _fused_blend_skin_kernel(coef_ref, w_ref, vt_ref, aT_ref, wT_ref,
                             naked_ref, verts_ref):
    """Per vertex-lane tile:
         naked[c]  = vt[c] + coeffs @ W_blend[c]          (B, TV)  (= v_posed)
         Tt        = A_flat @ W_skin^T                    (B*16, TV)
         verts[b,r]= Tt[b,4r:4r+3] . naked[b] + Tt[b,4r+3]
       v_posed stays in registers; naked / verts are stored as single
       lane-dense (B*3, TV) blocks (unmasked stores).
    """
    coef = coef_ref[...]                                   # (B, 217) bf16

    # merged shape + pose blend offsets, one MXU pass per xyz component
    naked_c = []
    for c in range(3):                                     # static unroll (3)
        off = jnp.dot(coef, w_ref[c],
                      preferred_element_type=jnp.float32)  # (B, TV) f32
        naked_c.append(off + vt_ref[c:c + 1, :])           # + template row

    # transposed LBS: batch folded into MXU M; lane-dense V on the output
    Tt = jnp.dot(aT_ref[...], wT_ref[...],
                 preferred_element_type=jnp.float32)       # (B*16, TV) f32

    naked_rows = []
    vert_rows = []
    for b in range(B):                                     # static unroll (B)
        x = naked_c[0][b:b + 1, :]                         # (1, TV)
        y = naked_c[1][b:b + 1, :]
        z = naked_c[2][b:b + 1, :]
        naked_rows += [x, y, z]
        base = 16 * b
        for r in range(3):                                 # homogeneous apply
            o = base + 4 * r
            vert_rows.append(Tt[o + 0:o + 1, :] * x
                             + Tt[o + 1:o + 2, :] * y
                             + Tt[o + 2:o + 3, :] * z
                             + Tt[o + 3:o + 4, :])         # (1, TV)

    # one full-block unmasked store per output (rows are b-major, xyz-minor)
    naked_ref[...] = jnp.concatenate(naked_rows, axis=0)   # (B*3, TV)
    verts_ref[...] = jnp.concatenate(vert_rows, axis=0)    # (B*3, TV)


def fused_blend_skin(coeffs, w_blend, vt3, a_flat, wT):
    n_vt = V // TV
    return pl.pallas_call(
        _fused_blend_skin_kernel,
        out_shape=(jax.ShapeDtypeStruct((B * 3, V), jnp.float32),
                   jax.ShapeDtypeStruct((B * 3, V), jnp.float32)),
        grid=(n_vt,),
        in_specs=[pl.BlockSpec((B, NCOEF), lambda v: (0, 0)),
                  pl.BlockSpec((3, NCOEF, TV), lambda v: (0, 0, v)),
                  pl.BlockSpec((3, TV), lambda v: (0, v)),
                  pl.BlockSpec((B * 16, J), lambda v: (0, 0)),
                  pl.BlockSpec((J, TV), lambda v: (0, v))],
        out_specs=(pl.BlockSpec((B * 3, TV), lambda v: (0, v)),
                   pl.BlockSpec((B * 3, TV), lambda v: (0, v))),
        compiler_params=pltpu.CompilerParams(
            dimension_semantics=("parallel",)),
    )(coeffs, w_blend, vt3, a_flat, wT)


# ------------------------------- JAX glue ----------------------------------

def rodrigues(axisang):
    """(N, 3) axis-angle -> (N, 3, 3) rotation matrices (quaternion path,
    same math as smplpytorch's th_posemap_axisang)."""
    angle = jnp.linalg.norm(axisang + 1e-8, axis=1, keepdims=True)
    axis = axisang / angle
    half = angle * 0.5
    w = jnp.cos(half)[:, 0]
    sxyz = jnp.sin(half) * axis
    x, y, z = sxyz[:, 0], sxyz[:, 1], sxyz[:, 2]
    w2, x2, y2, z2 = w * w, x * x, y * y, z * z
    wx, wy, wz = w * x, w * y, w * z
    xy, xz, yz = x * y, x * z, y * z
    rot = jnp.stack([
        w2 + x2 - y2 - z2, 2 * (xy - wz),     2 * (xz + wy),
        2 * (xy + wz),     w2 - x2 + y2 - z2, 2 * (yz - wx),
        2 * (xz - wy),     2 * (yz + wx),     w2 - x2 - y2 + z2,
    ], axis=1)
    return rot.reshape(-1, 3, 3)


def smpl_forward(params, pose_axisang, betas, trans, scale=1.0):
    # pose map (axis-angle -> rotmats, subtract flat identity)
    rot = rodrigues(pose_axisang.reshape(B * J, 3)).reshape(B, J, 3, 3)
    eye3 = jnp.eye(3, dtype=jnp.float32)
    pose_map = (rot[:, 1:] - eye3).reshape(B, POSE_FEATS)
    # bf16 coefficients keep the whole blend matmul single-pass on the MXU;
    # keep them f32 instead if sub-1% blend-offset error matters downstream.
    coeffs = jnp.concatenate([betas, pose_map], axis=1).astype(jnp.bfloat16)

    # joints via the OFFLINE-folded regressor (tiny f32 matmul, exact by linearity)
    th_j = params['j_template'][None] + jnp.einsum('bn,njc->bjc',
                                                   betas, params['j_dirs'])

    # kinematic chain, batched by tree depth (8 levels of batched 4x4 matmuls)
    # TODO(synk): serial parent-chain of tiny 4x4 matmuls stays in JAX glue;
    # a Pallas/SMEM version gives no benefit at these shapes.
    t_rel = th_j - th_j[:, PARENTS_CLAMPED]
    t_rel = t_rel.at[:, 0].set(th_j[:, 0])
    rel = jnp.concatenate([rot, t_rel[..., None]], axis=-1)       # (B,J,3,4)
    bottom = jnp.broadcast_to(jnp.array([0., 0., 0., 1.], jnp.float32),
                              (B, J, 1, 4))
    rel = jnp.concatenate([rel, bottom], axis=2)                  # (B,J,4,4)
    glob = rel
    for lvl in TREE_LEVELS:
        par = PARENTS_NP[lvl]
        upd = jnp.einsum('bjik,bjkl->bjil', glob[:, par], rel[:, lvl])
        glob = glob.at[:, lvl].set(upd)
    th_jtr = glob[:, :, :3, 3]

    # A = G - pack(G . j_rest), flattened row-major, batch stacked into MXU M
    tmp = jnp.einsum('bjrc,bjc->bjr', glob[..., :3], th_j)        # (B,J,4)
    a2 = glob.at[..., 3].add(-tmp)                                # (B,J,4,4)
    a_flat = jnp.transpose(a2.reshape(B, J, 16), (0, 2, 1)).reshape(B * 16, J)
    a_flat = a_flat.astype(jnp.bfloat16)

    # fused blend-shapes + LBS skinning (single Pallas kernel; v_posed never
    # leaves VMEM)
    naked_flat, verts_flat = fused_blend_skin(coeffs, params['w_blend'],
                                              params['vt3'], a_flat,
                                              params['wT'])
    naked3 = naked_flat.reshape(B, 3, V)
    verts3 = verts_flat.reshape(B, 3, V)

    # TODO(synk): skip these relayouts and return (B,3,V) if downstream can
    # consume the lane-dense layout; kept here to match the module contract.
    naked = jnp.swapaxes(naked3, 1, 2)                            # (B,V,3)
    th_verts = jnp.swapaxes(verts3, 1, 2) * scale + trans[:, None, :]
    th_jtr = th_jtr * scale + trans[:, None, :]
    return th_verts, th_jtr, naked, naked                         # th_v_posed == naked


def make_params(key):
    ks = jax.random.split(key, 5)
    v_template = jax.random.normal(ks[0], (V, 3), jnp.float32) * 0.5
    shapedirs = jax.random.normal(ks[1], (V, 3, NB), jnp.float32) * 0.01
    posedirs = jax.random.normal(ks[2], (V, 3, POSE_FEATS), jnp.float32) * 0.01
    jreg = jax.random.uniform(ks[3], (J, V), jnp.float32) + 1e-3
    jreg = jreg / jnp.sum(jreg, axis=1, keepdims=True)
    weights = jax.random.uniform(ks[4], (V, J), jnp.float32) + 1e-3
    weights = weights / jnp.sum(weights, axis=1, keepdims=True)

    # merged blend-shape weights, component-major, bf16 (bandwidth-bound stream)
    w_blend = jnp.concatenate([jnp.transpose(shapedirs, (1, 2, 0)),
                               jnp.transpose(posedirs, (1, 2, 0))],
                              axis=1)                             # (3, 217, V)

    # joint regressor folded into template / shape dirs (exact, offline)
    j_template = jreg @ v_template                                # (J, 3)
    j_dirs = jnp.einsum('jv,vcn->njc', jreg, shapedirs)           # (NB, J, 3)

    return {
        'w_blend': w_blend.astype(jnp.bfloat16),                  # (3, 217, V) bf16
        'vt3': jnp.transpose(v_template),                         # (3, V)      f32
        'wT': jnp.transpose(weights).astype(jnp.bfloat16),        # (J, V)      bf16
        'j_template': j_template,                                 # (J, 3)      f32
        'j_dirs': j_dirs,                                         # (NB, J, 3)  f32
    }


if __name__ == "__main__":
    key = jax.random.PRNGKey(0)
    k_param, k_pose, k_beta, k_trans = jax.random.split(key, 4)
    params = make_params(k_param)

    pose_axisang = jax.random.normal(k_pose, (B, J * 3), jnp.float32) * 0.2
    betas = jax.random.normal(k_beta, (B, NB), jnp.float32) * 0.5
    trans = jax.random.normal(k_trans, (B, 3), jnp.float32) * 0.1

    fwd = jax.jit(smpl_forward)
    th_verts, th_jtr, th_v_posed, naked = fwd(params, pose_axisang, betas,
                                              trans, 1.0)
    jax.block_until_ready((th_verts, th_jtr, th_v_posed, naked))

    assert th_verts.shape == (B, V, 3)
    assert th_jtr.shape == (B, J, 3)
    assert th_v_posed.shape == (B, V, 3)
    assert naked.shape == (B, V, 3)
    assert bool(jnp.all(jnp.isfinite(th_verts)))
    assert bool(jnp.all(jnp.isfinite(th_jtr)))
    assert bool(jnp.all(jnp.isfinite(naked)))
    print("KERNEL_OK")
</pallas_src>

<mosaic_0001>
module attributes {stable_mosaic.version = 11 : i64} {
  func.func @_fused_blend_skin_kernel(%arg0: i32, %arg1: memref<2x217xbf16, #tpu.memory_space<vmem>>, %arg2: memref<3x217x128xbf16, #tpu.memory_space<vmem>>, %arg3: memref<3x128xf32, #tpu.memory_space<vmem>>, %arg4: memref<32x24xbf16, #tpu.memory_space<vmem>>, %arg5: memref<24x128xbf16, #tpu.memory_space<vmem>>, %arg6: memref<6x128xf32, #tpu.memory_space<vmem>>, %arg7: memref<6x128xf32, #tpu.memory_space<vmem>>) attributes {dimension_semantics = [#tpu.dimension_semantics<parallel>], iteration_bounds = array<i64: 2>, scalar_prefetch = 0 : i64, scratch_operands = 0 : i64, tpu.core_type = #tpu.core_type<tc>, window_params = [{pipeline_mode = #tpu.pipeline_mode<synchronous>, transform_indices = @transform_0, window_bounds = array<i64: 2, 217>}, {transform_indices = @transform_1, window_bounds = array<i64: 3, 217, 128>}, {transform_indices = @transform_2, window_bounds = array<i64: 3, 128>}, {pipeline_mode = #tpu.pipeline_mode<synchronous>, transform_indices = @transform_3, window_bounds = array<i64: 32, 24>}, {transform_indices = @transform_4, window_bounds = array<i64: 24, 128>}, {transform_indices = @transform_5, window_bounds = array<i64: 6, 128>}, {transform_indices = @transform_6, window_bounds = array<i64: 6, 128>}]} {
    %c0 = arith.constant 0 : index
    %c0_0 = arith.constant 0 : index
    %0 = vector.load %arg1[%c0, %c0_0] : memref<2x217xbf16, #tpu.memory_space<vmem>>, vector<2x217xbf16>
    %c0_1 = arith.constant 0 : index
    %c0_2 = arith.constant 0 : index
    %c0_3 = arith.constant 0 : index
    %1 = vector.load %arg2[%c0_1, %c0_2, %c0_3] : memref<3x217x128xbf16, #tpu.memory_space<vmem>>, vector<1x217x128xbf16>
    %2 = vector.shape_cast %1 : vector<1x217x128xbf16> to vector<217x128xbf16>
    %cst = arith.constant dense<0.000000e+00> : vector<2x128xf32>
    %3 = tpu.matmul %0, %2, %cst {dimension_numbers = #tpu.dot_dimension_numbers<[1], [0], [0], [1], [0, 0, 1, 1], [], []>} : vector<2x217xbf16>, vector<217x128xbf16>, vector<2x128xf32> -> vector<2x128xf32>
    %c0_4 = arith.constant 0 : index
    %c0_5 = arith.constant 0 : index
    %4 = vector.load %arg3[%c0_4, %c0_5] : memref<3x128xf32, #tpu.memory_space<vmem>>, vector<1x128xf32>
    %5 = vector.broadcast %4 : vector<1x128xf32> to vector<2x128xf32>
    %6 = arith.addf %3, %5 : vector<2x128xf32>
    %c1 = arith.constant 1 : index
    %c0_6 = arith.constant 0 : index
    %c0_7 = arith.constant 0 : index
    %7 = vector.load %arg2[%c1, %c0_6, %c0_7] : memref<3x217x128xbf16, #tpu.memory_space<vmem>>, vector<1x217x128xbf16>
    %8 = vector.shape_cast %7 : vector<1x217x128xbf16> to vector<217x128xbf16>
    %cst_8 = arith.constant dense<0.000000e+00> : vector<2x128xf32>
    %9 = tpu.matmul %0, %8, %cst_8 {dimension_numbers = #tpu.dot_dimension_numbers<[1], [0], [0], [1], [0, 0, 1, 1], [], []>} : vector<2x217xbf16>, vector<217x128xbf16>, vector<2x128xf32> -> vector<2x128xf32>
    %c1_9 = arith.constant 1 : index
    %c0_10 = arith.constant 0 : index
    %10 = vector.load %arg3[%c1_9, %c0_10] : memref<3x128xf32, #tpu.memory_space<vmem>>, vector<1x128xf32>
    %11 = vector.broadcast %10 : vector<1x128xf32> to vector<2x128xf32>
    %12 = arith.addf %9, %11 : vector<2x128xf32>
    %c2 = arith.constant 2 : index
    %c0_11 = arith.constant 0 : index
    %c0_12 = arith.constant 0 : index
    %13 = vector.load %arg2[%c2, %c0_11, %c0_12] : memref<3x217x128xbf16, #tpu.memory_space<vmem>>, vector<1x217x128xbf16>
    %14 = vector.shape_cast %13 : vector<1x217x128xbf16> to vector<217x128xbf16>
    %cst_13 = arith.constant dense<0.000000e+00> : vector<2x128xf32>
    %15 = tpu.matmul %0, %14, %cst_13 {dimension_numbers = #tpu.dot_dimension_numbers<[1], [0], [0], [1], [0, 0, 1, 1], [], []>} : vector<2x217xbf16>, vector<217x128xbf16>, vector<2x128xf32> -> vector<2x128xf32>
    %c2_14 = arith.constant 2 : index
    %c0_15 = arith.constant 0 : index
    %16 = vector.load %arg3[%c2_14, %c0_15] : memref<3x128xf32, #tpu.memory_space<vmem>>, vector<1x128xf32>
    %17 = vector.broadcast %16 : vector<1x128xf32> to vector<2x128xf32>
    %18 = arith.addf %15, %17 : vector<2x128xf32>
    %c0_16 = arith.constant 0 : index
    %c0_17 = arith.constant 0 : index
    %19 = vector.load %arg4[%c0_16, %c0_17] : memref<32x24xbf16, #tpu.memory_space<vmem>>, vector<32x24xbf16>
    %c0_18 = arith.constant 0 : index
    %c0_19 = arith.constant 0 : index
    %20 = vector.load %arg5[%c0_18, %c0_19] : memref<24x128xbf16, #tpu.memory_space<vmem>>, vector<24x128xbf16>
    %cst_20 = arith.constant dense<0.000000e+00> : vector<32x128xf32>
    %21 = tpu.matmul %19, %20, %cst_20 {dimension_numbers = #tpu.dot_dimension_numbers<[1], [0], [0], [1], [0, 0, 1, 1], [], []>} : vector<32x24xbf16>, vector<24x128xbf16>, vector<32x128xf32> -> vector<32x128xf32>
    %22 = vector.extract_strided_slice %6 {offsets = [0, 0], sizes = [1, 128], strides = [1, 1]} : vector<2x128xf32> to vector<1x128xf32>
    %23 = vector.extract_strided_slice %12 {offsets = [0, 0], sizes = [1, 128], strides = [1, 1]} : vector<2x128xf32> to vector<1x128xf32>
    %24 = vector.extract_strided_slice %18 {offsets = [0, 0], sizes = [1, 128], strides = [1, 1]} : vector<2x128xf32> to vector<1x128xf32>
    %25 = vector.extract_strided_slice %21 {offsets = [0, 0], sizes = [1, 128], strides = [1, 1]} : vector<32x128xf32> to vector<1x128xf32>
    %26 = arith.mulf %25, %22 : vector<1x128xf32>
    %27 = vector.extract_strided_slice %21 {offsets = [1, 0], sizes = [1, 128], strides = [1, 1]} : vector<32x128xf32> to vector<1x128xf32>
    %28 = arith.mulf %27, %23 : vector<1x128xf32>
    %29 = arith.addf %26, %28 : vector<1x128xf32>
    %30 = vector.extract_strided_slice %21 {offsets = [2, 0], sizes = [1, 128], strides = [1, 1]} : vector<32x128xf32> to vector<1x128xf32>
    %31 = arith.mulf %30, %24 : vector<1x128xf32>
    %32 = arith.addf %29, %31 : vector<1x128xf32>
    %33 = vector.extract_strided_slice %21 {offsets = [3, 0], sizes = [1, 128], strides = [1, 1]} : vector<32x128xf32> to vector<1x128xf32>
    %34 = arith.addf %32, %33 : vector<1x128xf32>
    %35 = vector.extract_strided_slice %21 {offsets = [4, 0], sizes = [1, 128], strides = [1, 1]} : vector<32x128xf32> to vector<1x128xf32>
    %36 = arith.mulf %35, %22 : vector<1x128xf32>
    %37 = vector.extract_strided_slice %21 {offsets = [5, 0], sizes = [1, 128], strides = [1, 1]} : vector<32x128xf32> to vector<1x128xf32>
    %38 = arith.mulf %37, %23 : vector<1x128xf32>
    %39 = arith.addf %36, %38 : vector<1x128xf32>
    %40 = vector.extract_strided_slice %21 {offsets = [6, 0], sizes = [1, 128], strides = [1, 1]} : vector<32x128xf32> to vector<1x128xf32>
    %41 = arith.mulf %40, %24 : vector<1x128xf32>
    %42 = arith.addf %39, %41 : vector<1x128xf32>
    %43 = vector.extract_strided_slice %21 {offsets = [7, 0], sizes = [1, 128], strides = [1, 1]} : vector<32x128xf32> to vector<1x128xf32>
    %44 = arith.addf %42, %43 : vector<1x128xf32>
    %45 = vector.extract_strided_slice %21 {offsets = [8, 0], sizes = [1, 128], strides = [1, 1]} : vector<32x128xf32> to vector<1x128xf32>
    %46 = arith.mulf %45, %22 : vector<1x128xf32>
    %47 = vector.extract_strided_slice %21 {offsets = [9, 0], sizes = [1, 128], strides = [1, 1]} : vector<32x128xf32> to vector<1x128xf32>
    %48 = arith.mulf %47, %23 : vector<1x128xf32>
    %49 = arith.addf %46, %48 : vector<1x128xf32>
    %50 = vector.extract_strided_slice %21 {offsets = [10, 0], sizes = [1, 128], strides = [1, 1]} : vector<32x128xf32> to vector<1x128xf32>
    %51 = arith.mulf %50, %24 : vector<1x128xf32>
    %52 = arith.addf %49, %51 : vector<1x128xf32>
    %53 = vector.extract_strided_slice %21 {offsets = [11, 0], sizes = [1, 128], strides = [1, 1]} : vector<32x128xf32> to vector<1x128xf32>
    %54 = arith.addf %52, %53 : vector<1x128xf32>
    %55 = vector.extract_strided_slice %6 {offsets = [1, 0], sizes = [1, 128], strides = [1, 1]} : vector<2x128xf32> to vector<1x128xf32>
    %56 = vector.extract_strided_slice %12 {offsets = [1, 0], sizes = [1, 128], strides = [1, 1]} : vector<2x128xf32> to vector<1x128xf32>
    %57 = vector.extract_strided_slice %18 {offsets = [1, 0], sizes = [1, 128], strides = [1, 1]} : vector<2x128xf32> to vector<1x128xf32>
    %58 = vector.extract_strided_slice %21 {offsets = [16, 0], sizes = [1, 128], strides = [1, 1]} : vector<32x128xf32> to vector<1x128xf32>
    %59 = arith.mulf %58, %55 : vector<1x128xf32>
    %60 = vector.extract_strided_slice %21 {offsets = [17, 0], sizes = [1, 128], strides = [1, 1]} : vector<32x128xf32> to vector<1x128xf32>
    %61 = arith.mulf %60, %56 : vector<1x128xf32>
    %62 = arith.addf %59, %61 : vector<1x128xf32>
    %63 = vector.extract_strided_slice %21 {offsets = [18, 0], sizes = [1, 128], strides = [1, 1]} : vector<32x128xf32> to vector<1x128xf32>
    %64 = arith.mulf %63, %57 : vector<1x128xf32>
    %65 = arith.addf %62, %64 : vector<1x128xf32>
    %66 = vector.extract_strided_slice %21 {offsets = [19, 0], sizes = [1, 128], strides = [1, 1]} : vector<32x128xf32> to vector<1x128xf32>
    %67 = arith.addf %65, %66 : vector<1x128xf32>
    %68 = vector.extract_strided_slice %21 {offsets = [20, 0], sizes = [1, 128], strides = [1, 1]} : vector<32x128xf32> to vector<1x128xf32>
    %69 = arith.mulf %68, %55 : vector<1x128xf32>
    %70 = vector.extract_strided_slice %21 {offsets = [21, 0], sizes = [1, 128], strides = [1, 1]} : vector<32x128xf32> to vector<1x128xf32>
    %71 = arith.mulf %70, %56 : vector<1x128xf32>
    %72 = arith.addf %69, %71 : vector<1x128xf32>
    %73 = vector.extract_strided_slice %21 {offsets = [22, 0], sizes = [1, 128], strides = [1, 1]} : vector<32x128xf32> to vector<1x128xf32>
    %74 = arith.mulf %73, %57 : vector<1x128xf32>
    %75 = arith.addf %72, %74 : vector<1x128xf32>
    %76 = vector.extract_strided_slice %21 {offsets = [23, 0], sizes = [1, 128], strides = [1, 1]} : vector<32x128xf32> to vector<1x128xf32>
    %77 = arith.addf %75, %76 : vector<1x128xf32>
    %78 = vector.extract_strided_slice %21 {offsets = [24, 0], sizes = [1, 128], strides = [1, 1]} : vector<32x128xf32> to vector<1x128xf32>
    %79 = arith.mulf %78, %55 : vector<1x128xf32>
    %80 = vector.extract_strided_slice %21 {offsets = [25, 0], sizes = [1, 128], strides = [1, 1]} : vector<32x128xf32> to vector<1x128xf32>
    %81 = arith.mulf %80, %56 : vector<1x128xf32>
    %82 = arith.addf %79, %81 : vector<1x128xf32>
    %83 = vector.extract_strided_slice %21 {offsets = [26, 0], sizes = [1, 128], strides = [1, 1]} : vector<32x128xf32> to vector<1x128xf32>
    %84 = arith.mulf %83, %57 : vector<1x128xf32>
    %85 = arith.addf %82, %84 : vector<1x128xf32>
    %86 = vector.extract_strided_slice %21 {offsets = [27, 0], sizes = [1, 128], strides = [1, 1]} : vector<32x128xf32> to vector<1x128xf32>
    %87 = arith.addf %85, %86 : vector<1x128xf32>
    %88 = tpu.concatenate %22, %23, %24, %55, %56, %57 in 0 : vector<1x128xf32>, vector<1x128xf32>, vector<1x128xf32>, vector<1x128xf32>, vector<1x128xf32>, vector<1x128xf32> -> vector<6x128xf32>
    %c0_21 = arith.constant 0 : index
    %c0_22 = arith.constant 0 : index
    %89 = vector.load %arg6[%c0_21, %c0_22] : memref<6x128xf32, #tpu.memory_space<vmem>>, vector<6x128xf32>
    tpu.vector_store %arg6[%c0_21, %c0_22], %88 {strides = array<i32>} : memref<6x128xf32, #tpu.memory_space<vmem>>, vector<6x128xf32>,
    %90 = tpu.concatenate %34, %44, %54, %67, %77, %87 in 0 : vector<1x128xf32>, vector<1x128xf32>, vector<1x128xf32>, vector<1x128xf32>, vector<1x128xf32>, vector<1x128xf32> -> vector<6x128xf32>
    %c0_23 = arith.constant 0 : index
    %c0_24 = arith.constant 0 : index
    %91 = vector.load %arg7[%c0_23, %c0_24] : memref<6x128xf32, #tpu.memory_space<vmem>>, vector<6x128xf32>
    tpu.vector_store %arg7[%c0_23, %c0_24], %90 {strides = array<i32>} : memref<6x128xf32, #tpu.memory_space<vmem>>, vector<6x128xf32>,
    return
  }
  func.func @transform_0(%arg0: i32) -> (i32, i32) {
    %c0_i32 = arith.constant 0 : i32
    %c0_i32_0 = arith.constant 0 : i32
    %c0_i32_1 = arith.constant 0 : i32
    return %c0_i32, %c0_i32_0 : i32, i32
  }
  func.func @transform_1(%arg0: i32) -> (i32, i32, i32) {
    %c0_i32 = arith.constant 0 : i32
    %c0_i32_0 = arith.constant 0 : i32
    %c0_i32_1 = arith.constant 0 : i32
    return %c0_i32, %c0_i32_0, %arg0 : i32, i32, i32
  }
  func.func @transform_2(%arg0: i32) -> (i32, i32) {
    %c0_i32 = arith.constant 0 : i32
    %c0_i32_0 = arith.constant 0 : i32
    return %c0_i32, %arg0 : i32, i32
  }
  func.func @transform_3(%arg0: i32) -> (i32, i32) {
    %c0_i32 = arith.constant 0 : i32
    %c0_i32_0 = arith.constant 0 : i32
    %c0_i32_1 = arith.constant 0 : i32
    return %c0_i32, %c0_i32_0 : i32, i32
  }
  func.func @transform_4(%arg0: i32) -> (i32, i32) {
    %c0_i32 = arith.constant 0 : i32
    %c0_i32_0 = arith.constant 0 : i32
    return %c0_i32, %arg0 : i32, i32
  }
  func.func @transform_5(%arg0: i32) -> (i32, i32) {
    %c0_i32 = arith.constant 0 : i32
    %c0_i32_0 = arith.constant 0 : i32
    return %c0_i32, %arg0 : i32, i32
  }
  func.func @transform_6(%arg0: i32) -> (i32, i32) {
    %c0_i32 = arith.constant 0 : i32
    %c0_i32_0 = arith.constant 0 : i32
    return %c0_i32, %arg0 : i32, i32
  }
}

</mosaic_0001>

<bundles_post_ra>
// kernel: neg.6
= control target key start
LH: loop header
LB: loop body
LE: loop exit
PB: predicated region body
PF: predicated region fallthrough
CT: control target
= control target key end

     0   :  { %s40_s0 = inlined_call_operand.vmem [shape: f32[2,24,4], index: 0, kind: input, shape index: {}]   ;;  %s41_s1 = inlined_call_operand.vmem [shape: f32[2,24,4], index: 1, kind: output, shape index: {}]  }
   0x1   :  { %v2_v0 = vld [vmem:[%s40_s0] sm:$0xf]  ;;  %v16_v1 = vld [vmem:[%s40_s0 + $0x4] sm:$0xf] }
   0x2   :  { %v5_v2 = vxor.u32 2147483648, %v2_v0  ;;  %v12_v3 = vxor.u32 2147483648, %v16_v1 }
   0x4   :  { %7 = vst [vmem:[%s41_s1] sm:$0xf] %v5_v2  ;;  %17 = vst [vmem:[%s41_s1 + $0x4] sm:$0xf] %v12_v3 }

// kernel: smpl_forward.1
= control target key start
LH: loop header
LB: loop body
LE: loop exit
PB: predicated region body
PF: predicated region fallthrough
CT: control target
= control target key end

     0   :  { %s1857_s21 = smov 0   ;;  %s1859_s22 = smov 0   ;;  %s2306_s0 = inlined_call_operand.vmem [shape: bf16[2,217], index: 0, kind: input, shape index: {}]   ;;  %s2307_s1 = inlined_call_operand.vmem [shape: bf16[3,217,256], index: 1, kind: input, shape index: {}]   ;;  %s2308_s2 = inlined_call_operand.vmem [shape: f32[3,256], index: 2, kind: input, shape index: {}]   ;;  %s2309_s3 = inlined_call_operand.vmem [shape: bf16[32,24], index: 3, kind: input, shape index: {}]   ;;  %s2310_s4 = inlined_call_operand.vmem [shape: bf16[24,256], index: 4, kind: input, shape index: {}]   ;;  %s2311_s5 = inlined_call_operand.vmem [shape: f32[6,256], index: 5, kind: output, shape index: {0}]   ;;  %s2312_s6 = inlined_call_operand.vmem [shape: f32[6,256], index: 6, kind: output, shape index: {1}]  }
   0x1   :  { %s1861_s23 = smov 0  }
   0x2 LB: > { %s1582_s24 = sadd.s32 4294967295, %s1817_s23   ;;  %s1874_s25 = sadd.s32 1, %s1817_s23   ;;  %s1817_s23 = sphi %s1861_s23, %s2316_s23   ;;  %s1813_s22 = sphi %s1859_s22, %s2315_s22   ;;  %s1809_s21 = sphi %s1857_s21, %s2314_s21  }
   0x3   : > { %s42_s26 = ssub.s32 %s1817_s23, %s1874_s25  ;;  %s45_s27 = sadd.s32 1, %s1813_s22 }
   0x4   : > { %p43_p0 = scmp.eq.s32.totalorder %s42_s26, 0  ;;  %p52_p1 = scmp.ne.s32.totalorder %s1813_s22, %s1809_s21 }
   0x5   : > { %p53_p2 = scmp.eq.s32.totalorder %s1817_s23, 0  ;;  %p1585_p4 = scmp.ge.s32.totalorder %s1817_s23, 2 }
   0x6   : > { %s1883_s28 = scalar_select %p43_p0, %s1813_s22, %s45_s27  }
   0x7   : > { %p1885_p3 = por %p53_p2, %p52_p1  ;;  %209 = sbr.rel (%p1585_p4) target bundleno = 79 (0x4f), region = 24 }
   0xc   : > { %212 = sbr.rel (!%p1885_p3) target bundleno = 72 (0x48), region = 28  ;;  %s214_s30 = sand.u32 (%p1885_p3), 1, %s1813_s22  }
   0xd   : > { %s1586_s7 = sshll.u32 (%p1885_p3), %s1817_s23, 2  ;;  %s1718_s8 = smul.u32 (%p1885_p3), 336, %s214_s30 }
   0xe   : > { %s1897_s11 = scalar_lea.vmem (%p1885_p3), %s2307_s1, %s1586_s7 }
   0xf   : > { %v235_v0 = vld [vmem:[%s1897_s11] sm:$0xf] (%p1885_p3)  ;;  %v237_v1 = vld [vmem:[%s1897_s11 + $0x8] sm:$0xf] (%p1885_p3)  ;;  %v239_v2 = vld [vmem:[%s1897_s11 + $0x10] sm:$0xf] (%p1885_p3) }
  0x10   : > { %v241_v3 = vld [vmem:[%s1897_s11 + $0x18] sm:$0xf] (%p1885_p3)  ;;  %v243_v4 = vld [vmem:[%s1897_s11 + $0x20] sm:$0xf] (%p1885_p3)  ;;  %s1904_s12 = scalar_lea.vmem (%p1885_p3), [#allocation2], %s1718_s8 }
  0x11   : > { %236 = vst [vmem:[%s1904_s12] sm:$0xf] %v235_v0  ;;  %238 = vst [vmem:[%s1904_s12 + $0x4] sm:$0xf] %v237_v1  ;;  %v245_v5 = vld [vmem:[%s1897_s11 + $0x28] sm:$0xf] }
  0x12   : > { %240 = vst [vmem:[%s1904_s12 + $0x8] sm:$0xf] %v239_v2  ;;  %242 = vst [vmem:[%s1904_s12 + $0xc] sm:$0xf] %v241_v3  ;;  %v247_v6 = vld [vmem:[%s1897_s11 + $0x30] sm:$0xf] }
  0x13   : > { %244 = vst [vmem:[%s1904_s12 + $0x10] sm:$0xf] %v243_v4  ;;  %v249_v7 = vld [vmem:[%s1897_s11 + $0x38] sm:$0xf]  ;;  %246 = vst [vmem:[%s1904_s12 + $0x14] sm:$0xf] %v245_v5 }
  0x14   : > { %248 = vst [vmem:[%s1904_s12 + $0x18] sm:$0xf] %v247_v6  ;;  %250 = vst [vmem:[%s1904_s12 + $0x1c] sm:$0xf] %v249_v7  ;;  %v251_v8 = vld [vmem:[%s1897_s11 + $0x40] sm:$0xf] }
  0x15   : > { %v253_v9 = vld [vmem:[%s1897_s11 + $0x48] sm:$0xf]  ;;  %v255_v10 = vld [vmem:[%s1897_s11 + $0x50] sm:$0xf]  ;;  %252 = vst [vmem:[%s1904_s12 + $0x20] sm:$0xf] %v251_v8 }
  0x16   : > { %254 = vst [vmem:[%s1904_s12 + $0x24] sm:$0xf] %v253_v9  ;;  %256 = vst [vmem:[%s1904_s12 + $0x28] sm:$0xf] %v255_v10  ;;  %v257_v11 = vld [vmem:[%s1897_s11 + $0x58] sm:$0xf] }
  0x17   : > { %v259_v12 = vld [vmem:[%s1897_s11 + $0x60] sm:$0xf]  ;;  %v261_v13 = vld [vmem:[%s1897_s11 + $0x68] sm:$0xf]  ;;  %258 = vst [vmem:[%s1904_s12 + $0x2c] sm:$0xf] %v257_v11 }
  0x18   : > { %260 = vst [vmem:[%s1904_s12 + $0x30] sm:$0xf] %v259_v12  ;;  %262 = vst [vmem:[%s1904_s12 + $0x34] sm:$0xf] %v261_v13  ;;  %v263_v14 = vld [vmem:[%s1897_s11 + $0x70] sm:$0xf] }
  0x19   : > { %v265_v15 = vld [vmem:[%s1897_s11 + $0x78] sm:$0xf]  ;;  %v267_v16 = vld [vmem:[%s1897_s11 + $0x80] sm:$0xf]  ;;  %264 = vst [vmem:[%s1904_s12 + $0x38] sm:$0xf] %v263_v14 }
  0x1a   : > { %266 = vst [vmem:[%s1904_s12 + $0x3c] sm:$0xf] %v265_v15  ;;  %268 = vst [vmem:[%s1904_s12 + $0x40] sm:$0xf] %v267_v16  ;;  %v269_v17 = vld [vmem:[%s1897_s11 + $0x88] sm:$0xf] }
  0x1b   : > { %v271_v18 = vld [vmem:[%s1897_s11 + $0x90] sm:$0xf]  ;;  %v273_v19 = vld [vmem:[%s1897_s11 + $0x98] sm:$0xf]  ;;  %270 = vst [vmem:[%s1904_s12 + $0x44] sm:$0xf] %v269_v17 }
  0x1c   : > { %272 = vst [vmem:[%s1904_s12 + $0x48] sm:$0xf] %v271_v18  ;;  %274 = vst [vmem:[%s1904_s12 + $0x4c] sm:$0xf] %v273_v19  ;;  %v275_v20 = vld [vmem:[%s1897_s11 + $0xa0] sm:$0xf] }
  0x1d   : > { %v277_v21 = vld [vmem:[%s1897_s11 + $0xa8] sm:$0xf]  ;;  %v279_v22 = vld [vmem:[%s1897_s11 + $0xb0] sm:$0xf]  ;;  %276 = vst [vmem:[%s1904_s12 + $0x50] sm:$0xf] %v275_v20 }
  0x1e   : > { %278 = vst [vmem:[%s1904_s12 + $0x54] sm:$0xf] %v277_v21  ;;  %280 = vst [vmem:[%s1904_s12 + $0x58] sm:$0xf] %v279_v22  ;;  %v281_v23 = vld [vmem:[%s1897_s11 + $0xb8] sm:$0xf] }
  0x1f   : > { %v283_v24 = vld [vmem:[%s1897_s11 + $0xc0] sm:$0xf]  ;;  %v285_v25 = vld [vmem:[%s1897_s11 + $0xc8] sm:$0xf]  ;;  %282 = vst [vmem:[%s1904_s12 + $0x5c] sm:$0xf] %v281_v23 }
  0x20   : > { %284 = vst [vmem:[%s1904_s12 + $0x60] sm:$0xf] %v283_v24  ;;  %286 = vst [vmem:[%s1904_s12 + $0x64] sm:$0xf] %v285_v25  ;;  %v287_v26 = vld [vmem:[%s1897_s11 + $0xd0] sm:$0xf] }
  0x21   : > { %v289_v27 = vld [vmem:[%s1897_s11 + $0xd8] sm:$0xf]  ;;  %v291_v28 = vld [vmem:[%s1897_s11 + $0xe0] sm:$0xf]  ;;  %288 = vst [vmem:[%s1904_s12 + $0x68] sm:$0xf] %v287_v26 }
  0x22   : > { %290 = vst [vmem:[%s1904_s12 + $0x6c] sm:$0xf] %v289_v27  ;;  %292 = vst [vmem:[%s1904_s12 + $0x70] sm:$0xf] %v291_v28  ;;  %v293_v29 = vld [vmem:[%s1897_s11 + $0xe8] sm:$0xf] }
  0x23   : > { %v295_v30 = vld [vmem:[%s1897_s11 + $0xf0] sm:$0xf]  ;;  %v297_v31 = vld [vmem:[%s1897_s11 + $0xf8] sm:$0xf]  ;;  %294 = vst [vmem:[%s1904_s12 + $0x74] sm:$0xf] %v293_v29 }
  0x24   : > { %296 = vst [vmem:[%s1904_s12 + $0x78] sm:$0xf] %v295_v30  ;;  %298 = vst [vmem:[%s1904_s12 + $0x7c] sm:$0xf] %v297_v31  ;;  %v299_v32 = vld [vmem:[%s1897_s11 + $0x100] sm:$0xf] }
  0x25   : > { %v301_v33 = vld [vmem:[%s1897_s11 + $0x108] sm:$0xf]  ;;  %v303_v34 = vld [vmem:[%s1897_s11 + $0x110] sm:$0xf]  ;;  %300 = vst [vmem:[%s1904_s12 + $0x80] sm:$0xf] %v299_v32 }
  0x26   : > { %302 = vst [vmem:[%s1904_s12 + $0x84] sm:$0xf] %v301_v33  ;;  %304 = vst [vmem:[%s1904_s12 + $0x88] sm:$0xf] %v303_v34  ;;  %v305_v35 = vld [vmem:[%s1897_s11 + $0x118] sm:$0xf] }
  0x27   : > { %v307_v36 = vld [vmem:[%s1897_s11 + $0x120] sm:$0xf]  ;;  %v309_v37 = vld [vmem:[%s1897_s11 + $0x128] sm:$0xf]  ;;  %306 = vst [vmem:[%s1904_s12 + $0x8c] sm:$0xf] %v305_v35 }
  0x28   : > { %308 = vst [vmem:[%s1904_s12 + $0x90] sm:$0xf] %v307_v36  ;;  %310 = vst [vmem:[%s1904_s12 + $0x94] sm:$0xf] %v309_v37  ;;  %v311_v38 = vld [vmem:[%s1897_s11 + $0x130] sm:$0xf] }
  0x29   : > { %v313_v39 = vld [vmem:[%s1897_s11 + $0x138] sm:$0xf]  ;;  %v315_v40 = vld [vmem:[%s1897_s11 + $0x140] sm:$0xf]  ;;  %312 = vst [vmem:[%s1904_s12 + $0x98] sm:$0xf] %v311_v38 }
  0x2a   : > { %314 = vst [vmem:[%s1904_s12 + $0x9c] sm:$0xf] %v313_v39  ;;  %316 = vst [vmem:[%s1904_s12 + $0xa0] sm:$0xf] %v315_v40  ;;  %v317_v41 = vld [vmem:[%s1897_s11 + $0x148] sm:$0xf] }
  0x2b   : > { %v319_v42 = vld [vmem:[%s1897_s11 + $0x150] sm:$0xf]  ;;  %v321_v43 = vld [vmem:[%s1897_s11 + $0x158] sm:$0xf]  ;;  %318 = vst [vmem:[%s1904_s12 + $0xa4] sm:$0xf] %v317_v41 }
  0x2c   : > { %320 = vst [vmem:[%s1904_s12 + $0xa8] sm:$0xf] %v319_v42  ;;  %322 = vst [vmem:[%s1904_s12 + $0xac] sm:$0xf] %v321_v43  ;;  %v323_v44 = vld [vmem:[%s1897_s11 + $0x160] sm:$0xf] }
  0x2d   : > { %v325_v45 = vld [vmem:[%s1897_s11 + $0x168] sm:$0xf]  ;;  %v327_v46 = vld [vmem:[%s1897_s11 + $0x170] sm:$0xf]  ;;  %324 = vst [vmem:[%s1904_s12 + $0xb0] sm:$0xf] %v323_v44 }
  0x2e   : > { %326 = vst [vmem:[%s1904_s12 + $0xb4] sm:$0xf] %v325_v45  ;;  %328 = vst [vmem:[%s1904_s12 + $0xb8] sm:$0xf] %v327_v46  ;;  %v329_v47 = vld [vmem:[%s1897_s11 + $0x178] sm:$0xf] }
  0x2f   : > { %v331_v48 = vld [vmem:[%s1897_s11 + $0x180] sm:$0xf]  ;;  %v333_v49 = vld [vmem:[%s1897_s11 + $0x188] sm:$0xf]  ;;  %330 = vst [vmem:[%s1904_s12 + $0xbc] sm:$0xf] %v329_v47 }
  0x30   : > { %332 = vst [vmem:[%s1904_s12 + $0xc0] sm:$0xf] %v331_v48  ;;  %334 = vst [vmem:[%s1904_s12 + $0xc4] sm:$0xf] %v333_v49  ;;  %v335_v50 = vld [vmem:[%s1897_s11 + $0x190] sm:$0xf] }
  0x31   : > { %v337_v51 = vld [vmem:[%s1897_s11 + $0x198] sm:$0xf]  ;;  %v339_v52 = vld [vmem:[%s1897_s11 + $0x1a0] sm:$0xf]  ;;  %336 = vst [vmem:[%s1904_s12 + $0xc8] sm:$0xf] %v335_v50 }
  0x32   : > { %338 = vst [vmem:[%s1904_s12 + $0xcc] sm:$0xf] %v337_v51  ;;  %340 = vst [vmem:[%s1904_s12 + $0xd0] sm:$0xf] %v339_v52  ;;  %v341_v53 = vld [vmem:[%s1897_s11 + $0x1a8] sm:$0xf] }
  0x33   : > { %v343_v54 = vld [vmem:[%s1897_s11 + $0x1b0] sm:$0xf]  ;;  %v345_v55 = vld [vmem:[%s1897_s11 + $0x1b8] sm:$0xf]  ;;  %342 = vst [vmem:[%s1904_s12 + $0xd4] sm:$0xf] %v341_v53 }
  0x34   : > { %344 = vst [vmem:[%s1904_s12 + $0xd8] sm:$0xf] %v343_v54  ;;  %346 = vst [vmem:[%s1904_s12 + $0xdc] sm:$0xf] %v345_v55  ;;  %v347_v56 = vld [vmem:[%s1897_s11 + $0x1c0] sm:$0xf] }
  0x35   : > { %v349_v57 = vld [vmem:[%s1897_s11 + $0x1c8] sm:$0xf]  ;;  %v351_v58 = vld [vmem:[%s1897_s11 + $0x1d0] sm:$0xf]  ;;  %348 = vst [vmem:[%s1904_s12 + $0xe0] sm:$0xf] %v347_v56 }
  0x36   : > { %350 = vst [vmem:[%s1904_s12 + $0xe4] sm:$0xf] %v349_v57  ;;  %352 = vst [vmem:[%s1904_s12 + $0xe8] sm:$0xf] %v351_v58  ;;  %v353_v59 = vld [vmem:[%s1897_s11 + $0x1d8] sm:$0xf] }
  0x37   : > { %v355_v60 = vld [vmem:[%s1897_s11 + $0x1e0] sm:$0xf]  ;;  %v357_v61 = vld [vmem:[%s1897_s11 + $0x1e8] sm:$0xf]  ;;  %354 = vst [vmem:[%s1904_s12 + $0xec] sm:$0xf] %v353_v59 }
  0x38   : > { %356 = vst [vmem:[%s1904_s12 + $0xf0] sm:$0xf] %v355_v60  ;;  %358 = vst [vmem:[%s1904_s12 + $0xf4] sm:$0xf] %v357_v61  ;;  %v359_v62 = vld [vmem:[%s1897_s11 + $0x1f0] sm:$0xf] }
  0x39   : > { %v361_v63 = vld [vmem:[%s1897_s11 + $0x1f8] sm:$0xf]  ;;  %v363_v0 = vld [vmem:[%s1897_s11 + $0x200] sm:$0xf]  ;;  %360 = vst [vmem:[%s1904_s12 + $0xf8] sm:$0xf] %v359_v62 }
  0x3a   : > { %362 = vst [vmem:[%s1904_s12 + $0xfc] sm:$0xf] %v361_v63  ;;  %364 = vst [vmem:[%s1904_s12 + $0x100] sm:$0xf] %v363_v0  ;;  %v365_v1 = vld [vmem:[%s1897_s11 + $0x208] sm:$0xf] }
  0x3b   : > { %v367_v2 = vld [vmem:[%s1897_s11 + $0x210] sm:$0xf]  ;;  %v369_v3 = vld [vmem:[%s1897_s11 + $0x218] sm:$0xf]  ;;  %366 = vst [vmem:[%s1904_s12 + $0x104] sm:$0xf] %v365_v1 }
  0x3c   : > { %368 = vst [vmem:[%s1904_s12 + $0x108] sm:$0xf] %v367_v2  ;;  %370 = vst [vmem:[%s1904_s12 + $0x10c] sm:$0xf] %v369_v3  ;;  %v371_v4 = vld [vmem:[%s1897_s11 + $0x220] sm:$0xf] }
  0x3d   : > { %v373_v5 = vld [vmem:[%s1897_s11 + $0x228] sm:$0xf]  ;;  %v375_v6 = vld [vmem:[%s1897_s11 + $0x230] sm:$0xf]  ;;  %372 = vst [vmem:[%s1904_s12 + $0x110] sm:$0xf] %v371_v4 }
  0x3e   : > { %374 = vst [vmem:[%s1904_s12 + $0x114] sm:$0xf] %v373_v5  ;;  %376 = vst [vmem:[%s1904_s12 + $0x118] sm:$0xf] %v375_v6  ;;  %v377_v7 = vld [vmem:[%s1897_s11 + $0x238] sm:$0xf] }
  0x3f   : > { %v379_v8 = vld [vmem:[%s1897_s11 + $0x240] sm:$0xf]  ;;  %v381_v9 = vld [vmem:[%s1897_s11 + $0x248] sm:$0xf]  ;;  %378 = vst [vmem:[%s1904_s12 + $0x11c] sm:$0xf] %v377_v7 }
  0x40   : > { %380 = vst [vmem:[%s1904_s12 + $0x120] sm:$0xf] %v379_v8  ;;  %382 = vst [vmem:[%s1904_s12 + $0x124] sm:$0xf] %v381_v9  ;;  %v383_v10 = vld [vmem:[%s1897_s11 + $0x250] sm:$0xf] }
  0x41   : > { %v385_v11 = vld [vmem:[%s1897_s11 + $0x258] sm:$0xf]  ;;  %v387_v12 = vld [vmem:[%s1897_s11 + $0x260] sm:$0xf]  ;;  %384 = vst [vmem:[%s1904_s12 + $0x128] sm:$0xf] %v383_v10 }
  0x42   : > { %386 = vst [vmem:[%s1904_s12 + $0x12c] sm:$0xf] %v385_v11  ;;  %388 = vst [vmem:[%s1904_s12 + $0x130] sm:$0xf] %v387_v12  ;;  %v389_v13 = vld [vmem:[%s1897_s11 + $0x268] sm:$0xf] }
  0x43   : > { %v391_v14 = vld [vmem:[%s1897_s11 + $0x270] sm:$0xf]  ;;  %v393_v15 = vld [vmem:[%s1897_s11 + $0x278] sm:$0xf]  ;;  %390 = vst [vmem:[%s1904_s12 + $0x134] sm:$0xf] %v389_v13 }
  0x44   : > { %392 = vst [vmem:[%s1904_s12 + $0x138] sm:$0xf] %v391_v14  ;;  %394 = vst [vmem:[%s1904_s12 + $0x13c] sm:$0xf] %v393_v15  ;;  %v395_v16 = vld [vmem:[%s1897_s11 + $0x280] sm:$0xf] }
  0x45   : > { %v397_v17 = vld [vmem:[%s1897_s11 + $0x288] sm:$0xf]  ;;  %v399_v18 = vld [vmem:[%s1897_s11 + $0x290] sm:$0xf]  ;;  %396 = vst [vmem:[%s1904_s12 + $0x140] sm:$0xf] %v395_v16 }
  0x46   : > { %398 = vst [vmem:[%s1904_s12 + $0x144] sm:$0xf] %v397_v17  ;;  %400 = vst [vmem:[%s1904_s12 + $0x148] sm:$0xf] %v399_v18  ;;  %v401_v19 = vld [vmem:[%s1897_s11 + $0x298] sm:$0xf] }
  0x47   : > { %402 = vst [vmem:[%s1904_s12 + $0x14c] sm:$0xf] %v401_v19 }
  0x48 PF: > { %601 = sbr.rel (!%p1885_p3) target bundleno = 79 (0x4f), region = 73  ;;  %s603_s13 = sand.u32 (%p1885_p3), 1, %s1813_s22  }
  0x49   : > { %s1587_s14 = sshll.u32 (%p1885_p3), %s1817_s23, 2  ;;  %s1719_s15 = smul.u32 (%p1885_p3), 12, %s603_s13 }
  0x4a   : > { %s607_s18 = scalar_lea.vmem (%p1885_p3), %s2310_s4, %s1587_s14 }
  0x4b   : > { %v624_v20 = vld [vmem:[%s607_s18] sm:$0xf] (%p1885_p3)  ;;  %v626_v21 = vld [vmem:[%s607_s18 + $0x8] sm:$0xf] (%p1885_p3)  ;;  %v628_v22 = vld [vmem:[%s607_s18 + $0x10] sm:$0xf] (%p1885_p3) }
  0x4c   : > { %s605_s19 = scalar_lea.vmem (%p1885_p3), [#allocation3], %s1719_s15 }
  0x4d   : > { %625 = vst [vmem:[%s605_s19] sm:$0xf] %v624_v20  ;;  %627 = vst [vmem:[%s605_s19 + $0x4] sm:$0xf] %v626_v21 }
  0x4e   : > { %629 = vst [vmem:[%s605_s19 + $0x8] sm:$0xf] %v628_v22 }
  0x4f PF: > { %p1588_p5 = scmp.ge.s32.totalorder %s1817_s23, 1  ;;  %p658_p6 = scmp.lt.s32.totalorder %s1817_s23, 3 }
  0x51   : > { %p659_p7 = pnand %p1588_p5, %p658_p6 }
  0x52   : > { %s665_s20 = sand.u32 (!%p659_p7), 1, %s1809_s21   ;;  %p712_p8 = scmp.lt.s32.totalorder (!%p659_p7), %s1582_s24, 1 }
  0x53   : > { %662 = sbr.rel (%p659_p7) target bundleno = 415 (0x19f), region = 114 }
  0x54   : > { %s1720_s26 = smul.u32 (!%p659_p7), 336, %s665_s20 }
  0x55   : > { %s2126_s7 = smul.u32 (!%p659_p7), 12, %s665_s20 }
  0x56   : > { %s2088_s30 = scalar_lea.vmem (!%p659_p7), [#allocation2], %s1720_s26 }
  0x57   : > { %s674_s21 = scalar_lea.vmem (!%p659_p7), [#allocation3], %s2126_s7 }
  0x58   : > { %v1819_v23 = vmov 0   ;;  %v771_v24 = vlaneseq  ;;  %v2086_v25 = vld.sshfl [vmem:[%s2306_s0] sm:$0x11 pattern:$0x75316420]  ;;  %v1749_v29 = vld [vmem:[%s2088_s30 + $0x38] sm:$0xff]  }
  0x59   : > { %877 = vmatprep.subr.bf16.mxu0 %v1819_v23  ;;  %1037 = vmatprep.subr.bf16.mxu1 %v1819_v23  ;;  %v1820_v26 = vmov 1966171168   ;;  %v1750_v30 = vld [vmem:[%s2088_s30 + $0xa8] sm:$0xff]   ;;  %v767_v31 = vcombine.high %v2086_v25, %v2086_v25  ;;  %v1751_v33 = vld [vmem:[%s2088_s30 + $0x30] sm:$0xff]   ;;  %v1752_v34 = vld [vmem:[%s2088_s30 + $0xa0] sm:$0xff]   ;;  %vm866_vm0 = vcmask 728064  }
  0x5a   : > { %v769_v27 = vunpack.c.l.s4 %v1820_v26  ;;  %v772_v28 = vshrl.u32 %v771_v24, 7  ;;  %878 = vmatpush1.bf16.msra.mxu0 %v1749_v29  ;;  %1038 = vmatpush1.bf16.msra.mxu1 %v1750_v30  ;;  %v1753_v37 = vld [vmem:[%s2088_s30 + $0x28] sm:$0xff]   ;;  %v1754_v38 = vld [vmem:[%s2088_s30 + $0x98] sm:$0xff]   ;;  %v1755_v39 = vld [vmem:[%s2088_s30 + $0x20] sm:$0xff]   ;;  %vm870_vm1 = vcmask 1043456   ;;  %vm871_vm2 = vcmask 1044480  }
  0x5b   : > { %879 = vmatprep.subr.bf16.mxu0 %v1819_v23  ;;  %1039 = vmatprep.subr.bf16.mxu1 %v1819_v23  ;;  %v1756_v40 = vld [vmem:[%s2088_s30 + $0x90] sm:$0xff]   ;;  %v1757_v41 = vld [vmem:[%s2088_s30 + $0x18] sm:$0xff]   ;;  %v1758_v42 = vld [vmem:[%s2088_s30 + $0x88] sm:$0xff]   ;;  %v1821_v45 = vmov 65535   ;;  %vm1263_vm3 = vcmask 195584   ;;  %s2318_s24 = smov (!%p712_p8, %s1582_s24), 1 }
  0x5c   : > { %v770_v32 = vunpack.c.0.s8 %v769_v27  ;;  %v1759_v43 = vld [vmem:[%s2088_s30 + $0x10] sm:$0xff]   ;;  %v1760_v44 = vld [vmem:[%s2088_s30 + $0x80] sm:$0xff]   ;;  %v872_v46 = vsel %vm870_vm1, 4294967295, %v1821_v45  ;;  %v1761_v47 = vld [vmem:[%s2088_s30 + $0x8] sm:$0xff]   ;;  %s1589_s12 = sshll.u32 %s2318_s24, 2  ;;  %vm1435_vm4 = vcmask 1040384  }
  0x5d   : > { %v1762_v48 = vld [vmem:[%s2088_s30 + $0x78] sm:$0xff]   ;;  %v1763_v49 = vld [vmem:[%s2088_s30] sm:$0xff]   ;;  %v2134_v50 = vsel %vm871_vm2, %v872_v46, 0  ;;  %v1764_v51 = vld [vmem:[%s2088_s30 + $0x70] sm:$0xff]   ;;  %s715_s15 = scalar_lea.vmem %s2308_s2, %s1589_s12  ;;  %vm1437_vm5 = vcmask 1041408   ;;  %vm1439_vm6 = vcmask 1042432  }
  0x5e   : > { %v2097_v35 = vsub.s32 %v770_v32, %v772_v28  ;;  %880 = vmatpush1.bf16.msra.mxu0 %v1751_v33  ;;  %1040 = vmatpush1.bf16.msra.mxu1 %v1752_v34  ;;  %v1765_v52 = vld [vmem:[%s2088_s30 + $0x68] sm:$0x1f]   ;;  %v1766_v53 = vld [vmem:[%s2088_s30 + $0xd8] sm:$0x1f]   ;;  %v1767_v56 = vld [vmem:[%s2088_s30 + $0x60] sm:$0xff]   ;;  %s1590_s23 = sshll.u32 %s2318_s24, 3 }
  0x5f   : > { %881 = vmatprep.subr.bf16.mxu0 %v1819_v23  ;;  %1041 = vmatprep.subr.bf16.mxu1 %v1819_v23  ;;  %v875_v54 = vand.u32 %v1765_v52, %v2134_v50  ;;  %v1035_v55 = vand.u32 %v1766_v53, %v2134_v50  ;;  %v1768_v57 = vld [vmem:[%s2088_s30 + $0xd0] sm:$0xff]   ;;  %v1769_v58 = vld [vmem:[%s2088_s30 + $0x58] sm:$0xff]   ;;  %v1770_v59 = vld [vmem:[%s2088_s30 + $0xc8] sm:$0xff]   ;;  %s719_s18 = scalar_lea.vmem %s2311_s5, %s1590_s23  ;;  %s723_s26 = scalar_lea.vmem %s2312_s6, %s1590_s23 }
  0x60   : > { %v2101_v36 = vrot.slane %v767_v31, %v2097_v35  ;;  %v1771_v60 = vld [vmem:[%s2088_s30 + $0x50] sm:$0xff]   ;;  %v1772_v61 = vld [vmem:[%s2088_s30 + $0xc0] sm:$0xff]   ;;  %v1773_v62 = vld [vmem:[%s2088_s30 + $0x48] sm:$0xff]   ;;  %v774_v3 = vrot.slane %v2086_v25, %v2097_v35 }
  0x61   : > { %v1774_v63 = vld [vmem:[%s2088_s30 + $0xb8] sm:$0xff]   ;;  %v1775_v0 = vld [vmem:[%s2088_s30 + $0x40] sm:$0xff]   ;;  %v1776_v1 = vld [vmem:[%s2088_s30 + $0xb0] sm:$0xff]  }
  0x62   : > { %1608 = vmatprep.mubr.msk.bf16.mxu0 %vm866_vm0, %v2101_v36  ;;  %1652 = vmatprep.mubr.msk.bf16.mxu1 %vm866_vm0, %v2101_v36  ;;  %v1777_v2 = vld [vmem:[%s674_s21 + $0x8] ss:$0 sps:$4 sm:$0xff]   ;;  %v1778_v4 = vld [vmem:[%s2088_s30 + $0x118] sm:$0xff]   ;;  %v1781_v7 = vld [vmem:[%s2309_s3] sm:$0xff]  }
  0x63   : > { %882 = vmatpush1.bf16.msra.mxu0 %v1753_v37  ;;  %1042 = vmatpush1.bf16.msra.mxu1 %v1754_v38  ;;  %v1271_v5 = vsel %vm870_vm1, %v1777_v2, 0  ;;  %v1779_v6 = vld [vmem:[%s674_s21] sm:$0xff]   ;;  %v1780_v8 = vld [vmem:[%s2088_s30 + $0x110] sm:$0xff]   ;;  %v1783_v10 = vld [vmem:[%s2088_s30 + $0x108] sm:$0xff]  }
  0x64   : > { %883 = vmatprep.subr.bf16.mxu0 %v1819_v23  ;;  %1043 = vmatprep.subr.bf16.mxu1 %v1819_v23  ;;  %v1782_v9 = vld [vmem:[%s2309_s3 + $0x8] sm:$0xff]   ;;  %v1784_v11 = vld [vmem:[%s2088_s30 + $0x100] sm:$0xff]   ;;  %v1786_v13 = vld [vmem:[%s2088_s30 + $0xf0] sm:$0xff]  }
  0x65   : > { %v1785_v12 = vld [vmem:[%s2088_s30 + $0xf8] sm:$0xff]   ;;  %v1787_v14 = vld [vmem:[%s2088_s30 + $0xe8] sm:$0xff]   ;;  %v1788_v15 = vld [vmem:[%s2088_s30 + $0xe0] sm:$0xff]  }
  0x66   : > { %v1789_v16 = vld [vmem:[%s2088_s30 + $0x148] sm:$0x1f]   ;;  %v1790_v18 = vld [vmem:[%s2088_s30 + $0x140] sm:$0xff]   ;;  %v1791_v19 = vld [vmem:[%s2088_s30 + $0x138] sm:$0xff]  }
  0x67   : > { %884 = vmatpush1.bf16.msra.mxu0 %v1755_v39  ;;  %1044 = vmatpush1.bf16.msra.mxu1 %v1756_v40  ;;  %v1195_v17 = vand.u32 %v1789_v16, %v2134_v50  ;;  %v1792_v20 = vld [vmem:[%s2088_s30 + $0x130] sm:$0xff]   ;;  %v1793_v21 = vld [vmem:[%s2088_s30 + $0x128] sm:$0xff]   ;;  %v1794_v22 = vld [vmem:[%s2088_s30 + $0x120] sm:$0xff]  }
  0x68   : > { %885 = vmatprep.subr.bf16.mxu0 %v1819_v23  ;;  %1045 = vmatprep.subr.bf16.mxu1 %v1819_v23  ;;  %v1592_v34 = vld [vmem:[%s715_s15] ss:$0 sm:$0xff]  ;;  %v1681_v52 = vld [vmem:[%s715_s15 + $0x2] ss:$0 sm:$0xff] }
  0x6b   : > { %886 = vmatpush1.bf16.msra.mxu0 %v1757_v41  ;;  %1046 = vmatpush1.bf16.msra.mxu1 %v1758_v42 }
  0x6c   : > { %887 = vmatprep.subr.bf16.mxu0 %v1819_v23  ;;  %1047 = vmatprep.subr.bf16.mxu1 %v1819_v23 }
  0x6f   : > { %888 = vmatpush1.bf16.msra.mxu0 %v1759_v43  ;;  %1048 = vmatpush1.bf16.msra.mxu1 %v1760_v44 }
  0x70   : > { %889 = vmatprep.subr.bf16.mxu0 %v1819_v23  ;;  %1049 = vmatprep.subr.bf16.mxu1 %v1819_v23 }
  0x73   : > { %890 = vmatpush1.bf16.msra.mxu0 %v1761_v47  ;;  %1050 = vmatpush1.bf16.msra.mxu1 %v1762_v48 }
  0x74   : > { %891 = vmatprep.subr.bf16.mxu0 %v1819_v23  ;;  %1051 = vmatprep.subr.bf16.mxu1 %v1819_v23 }
  0x77   : > { %892 = vmatpush1.bf16.msra.mxu0 %v1763_v49  ;;  %1052 = vmatpush1.bf16.msra.mxu1 %v1764_v51 }
  0x78   : > { %897 = vmatprep.subr.bf16.mxu0 %v1819_v23  ;;  %1057 = vmatprep.subr.bf16.mxu1 %v1819_v23 }
  0x7b   : > { %898 = vmatpush2.bf16.msra.mxu0 %v875_v54  ;;  %1058 = vmatpush2.bf16.msra.mxu1 %v1035_v55 }
  0x7c   : > { %899 = vmatprep.subr.bf16.mxu0 %v1819_v23  ;;  %1059 = vmatprep.subr.bf16.mxu1 %v1819_v23 }
  0x7f   : > { %900 = vmatpush2.bf16.msra.mxu0 %v1767_v56  ;;  %1060 = vmatpush2.bf16.msra.mxu1 %v1768_v57 }
  0x80   : > { %901 = vmatprep.subr.bf16.mxu0 %v1819_v23  ;;  %1061 = vmatprep.subr.bf16.mxu1 %v1819_v23 }
  0x83   : > { %902 = vmatpush2.bf16.msra.mxu0 %v1769_v58  ;;  %1062 = vmatpush2.bf16.msra.mxu1 %v1770_v59 }
  0x84   : > { %903 = vmatprep.subr.bf16.mxu0 %v1819_v23  ;;  %1063 = vmatprep.subr.bf16.mxu1 %v1819_v23 }
  0x87   : > { %904 = vmatpush2.bf16.msra.mxu0 %v1771_v60  ;;  %1064 = vmatpush2.bf16.msra.mxu1 %v1772_v61 }
  0x88   : > { %905 = vmatprep.subr.bf16.mxu0 %v1819_v23  ;;  %1065 = vmatprep.subr.bf16.mxu1 %v1819_v23 }
  0x8b   : > { %906 = vmatpush2.bf16.msra.mxu0 %v1773_v62  ;;  %1066 = vmatpush2.bf16.msra.mxu1 %v1774_v63 }
  0x8c   : > { %907 = vmatprep.subr.bf16.mxu0 %v1819_v23  ;;  %1067 = vmatprep.subr.bf16.mxu1 %v1819_v23 }
  0x8f   : > { %908 = vmatpush2.bf16.msra.mxu0 %v1775_v0  ;;  %1068 = vmatpush2.bf16.msra.mxu1 %v1776_v1 }
  0x90   : > { %1197 = vmatprep.subr.bf16.mxu0 %v1819_v23  ;;  %1717 = vmatprep.subr.msk.bf16.mxu1 %vm870_vm1, %v1777_v2 }
  0x92   : > { %910 = vmatmul.mubr.bf16.vlgmr.msra.gmra.mxu0 %v774_v3  ;;  %1070 = vmatmul.mubr.bf16.vlgmr.msra.gmra.mxu1 %v774_v3 }
  0x93   : > { %1198 = vmatpush1.bf16.msra.mxu0 %v1778_v4  ;;  %1710 = vmatpush3.bf16.msra.mxu1 %v1271_v5 }
  0x94   : > { %1199 = vmatprep.subr.bf16.mxu0 %v1819_v23  ;;  %1711 = vmatprep.subr.bf16.mxu1 %v1779_v6 }
  0x95   : > { %1713 = vmatprep.mubr.msk.bf16.mxu1 %vm1263_vm3, %v1781_v7  ;;  %1696 = vmatprep.mubr.msk.bf16.mxu0 %vm866_vm0, %v2101_v36 }
  0x97   : > { %1200 = vmatpush1.bf16.msra.mxu0 %v1780_v8  ;;  %1712 = vmatpush3.bf16.msra.mxu1 %v1779_v6 }
  0x98   : > { %1201 = vmatprep.subr.bf16.mxu0 %v1819_v23 }
  0x9a   : > { %1714 = vmatmul.mubr.msk.bf16.vlgmr.msra.gmra.mxu1 %vm1263_vm3, %v1782_v9 }
  0x9b   : > { %1202 = vmatpush1.bf16.msra.mxu0 %v1783_v10 }
  0x9c   : > { %1203 = vmatprep.subr.bf16.mxu0 %v1819_v23 }
  0x9f   : > { %1204 = vmatpush1.bf16.msra.mxu0 %v1784_v11 }
  0xa0   : > { %1205 = vmatprep.subr.bf16.mxu0 %v1819_v23 }
  0xa3   : > { %1206 = vmatpush1.bf16.msra.mxu0 %v1785_v12 }
  0xa4   : > { %1207 = vmatprep.subr.bf16.mxu0 %v1819_v23 }
  0xa7   : > { %1208 = vmatpush1.bf16.msra.mxu0 %v1786_v13 }
  0xa8   : > { %1209 = vmatprep.subr.bf16.mxu0 %v1819_v23 }
  0xab   : > { %1210 = vmatpush1.bf16.msra.mxu0 %v1787_v14 }
  0xac   : > { %1211 = vmatprep.subr.bf16.mxu0 %v1819_v23 }
  0xaf   : > { %1212 = vmatpush1.bf16.msra.mxu0 %v1788_v15 }
  0xb0   : > { %1217 = vmatprep.subr.bf16.mxu0 %v1819_v23 }
  0xb3   : > { %1218 = vmatpush2.bf16.msra.mxu0 %v1195_v17 }
  0xb4   : > { %1219 = vmatprep.subr.bf16.mxu0 %v1819_v23 }
  0xb7   : > { %1220 = vmatpush2.bf16.msra.mxu0 %v1790_v18 }
  0xb8   : > { %1221 = vmatprep.subr.bf16.mxu0 %v1819_v23 }
  0xbb   : > { %1222 = vmatpush2.bf16.msra.mxu0 %v1791_v19 }
  0xbc   : > { %1223 = vmatprep.subr.bf16.mxu0 %v1819_v23 }
  0xbf   : > { %1224 = vmatpush2.bf16.msra.mxu0 %v1792_v20 }
  0xc0   : > { %1225 = vmatprep.subr.bf16.mxu0 %v1819_v23 }
  0xc3   : > { %1226 = vmatpush2.bf16.msra.mxu0 %v1793_v21 }
  0xc4   : > { %1227 = vmatprep.subr.bf16.mxu0 %v1819_v23  ;;  %v1637_v23 = vld [vmem:[%s715_s15 + $0x1] ss:$0 sm:$0xff] }
  0xc7   : > { %1228 = vmatpush2.bf16.msra.mxu0 %v1794_v22 }
  0xca   : > { %1230 = vmatmul.mubr.bf16.vlgmr.msra.gmra.mxu0 %v774_v3 }
 0x152   : > { %v911_v24 = vpop.f32.mrf.mxu0  ;;  %v1071_v25 = vpop.f32.mrf.mxu1 }
 0x153   : > { %v2225_v35 = vadd.f32 %v1637_v23, %v1071_v25  ;;  %v2231_v39 = vadd.f32 %v1592_v34, %v911_v24 }
 0x154   : > { %v913_v26 = vpop.f32.mrf.mxu0  ;;  %v1073_v27 = vpop.f32.mrf.mxu1 }
 0x155   : > { %v1399_v37 = vrot.slane %v2225_v35, 4  ;;  %v1347_v38 = vrot.slane %v2225_v35, 3  ;;  %v1324_v41 = vrot.slane %v2225_v35, 7  ;;  %v1396_v46 = vrot.slane %v2231_v39, 5 }
 0x156   : > { %v914_v28 = vpop.f32.mrf.mxu0  ;;  %v1074_v29 = vpop.f32.mrf.mxu1  ;;  %v1344_v47 = vrot.slane %v2231_v39, 4  ;;  %v1377_v48 = vrot.slane %v2231_v39, 1  ;;  %v1429_v53 = vrot.slane %v2231_v39, 6  ;;  %v1431_v54 = vrot.slane %v2225_v35, 5 }
 0x157   : > { %v1436_v57 = vsel %vm1435_vm4, %v2231_v39, %v1324_v41 }
 0x158   : > { %v915_v30 = vpop.f32.mrf.mxu0  ;;  %v1075_v31 = vpop.f32.mrf.mxu1 }
 0x15a   : > { %v2218_v32 = vpop.f32.mrf.mxu1 }
 0x15b   : > { %v1380_v40 = vmul.f32 %v2218_v32, %v2225_v35  ;;  %v2239_v43 = vmul.f32 %v2218_v32, %v1399_v37  ;;  %v1393_v55 = vrot.slane %v2218_v32, 3  ;;  %v1398_v56 = vmul.f32 %v2218_v32, %v1396_v46 }
 0x15c   : > { %v2223_v33 = vpop.f32.mrf.mxu1  ;;  %v1379_v60 = vmul.f32 %v2218_v32, %v1377_v48 }
 0x15d   : > { %v1349_v44 = vmul.f32 %v1347_v38, %v2223_v33  ;;  %v1326_v45 = vmul.f32 %v1324_v41, %v2223_v33  ;;  %v1382_v49 = vrot.slane %v1380_v40, 1  ;;  %v1403_v58 = vrot.slane %v2239_v43, 1 }
 0x15e   : > { %v2227_v36 = vpop.f32.mrf.mxu1  ;;  %v1322_v63 = vmul.f32 %v2223_v33, %v2231_v39  ;;  %v1340_v0 = vrot.slane %v2223_v33, 3  ;;  %v1346_v1 = vmul.f32 %v1344_v47, %v2223_v33 }
 0x15f   : > { %v1415_v50 = vmul.f32 %v2227_v36, %v2225_v35  ;;  %v1351_v59 = vrot.slane %v1349_v44, 1  ;;  %v1328_v61 = vrot.slane %v1326_v45, 1  ;;  %v1384_v3 = vadd.f32 %v1382_v49, %v1379_v60 }
 0x160   : > { %v2236_v42 = vpop.f32.mrf.mxu1  ;;  %v1414_v4 = vmul.f32 %v2227_v36, %v1377_v48  ;;  %v1405_v40 = vadd.f32 %v1403_v58, %v1398_v56  ;;  %v1426_v44 = vrot.slane %v2227_v36, 3 }
 0x161   : > { %v1363_v51 = vmul.f32 %v1324_v41, %v2236_v42  ;;  %v1417_v5 = vrot.slane %v1415_v50, 1  ;;  %v1353_v12 = vadd.f32 %v1351_v59, %v1346_v1  ;;  %v1330_v13 = vadd.f32 %v1328_v61, %v1322_v63 }
 0x162   : > { %v1362_v14 = vmul.f32 %v2236_v42, %v2231_v39  ;;  %v1374_v15 = vrot.slane %v2236_v42, 3 }
 0x163   : > { %v1365_v6 = vrot.slane %v1363_v51, 1  ;;  %v1419_v31 = vadd.f32 %v1417_v5, %v1414_v4 }
 0x165   : > { %v1367_v21 = vadd.f32 %v1365_v6, %v1362_v14 }
 0x18a   : > { %v1231_v62 = vpop.f32.mrf.mxu0 }
 0x18b   : > { %v1232_v2 = vadd.f32 %v1681_v52, %v1231_v62 }
 0x18c   : > { %v1233_v7 = vpop.f32.mrf.mxu0 }
 0x18d   : > { %v1332_v8 = vrot.slane %v1232_v2, 6  ;;  %v1354_v9 = vrot.slane %v1232_v2, 2  ;;  %v1385_v10 = vrot.slane %v1232_v2, 7  ;;  %v1406_v11 = vrot.slane %v1232_v2, 3 }
 0x18e   : > { %v1234_v16 = vpop.f32.mrf.mxu0 }
 0x18f   : > { %v1334_v17 = vmul.f32 %v1332_v8, %v2223_v33  ;;  %v1356_v18 = vmul.f32 %v1354_v9, %v2223_v33  ;;  %v1368_v19 = vmul.f32 %v1332_v8, %v2236_v42  ;;  %v1387_v20 = vmul.f32 %v2218_v32, %v1385_v10 }
 0x190   : > { %v1408_v22 = vmul.f32 %v2218_v32, %v1406_v11  ;;  %v1420_v24 = vmul.f32 %v2227_v36, %v1385_v10  ;;  %v1438_v25 = vsel %vm1437_vm5, %v1436_v57, %v1332_v8  ;;  %v1235_v26 = vpop.f32.mrf.mxu0  ;;  %v1433_v42 = vrot.slane %v1232_v2, 4 }
 0x191   : > { %v1336_v27 = vrot.slane %v1334_v17, 2  ;;  %v1358_v28 = vrot.slane %v1356_v18, 2  ;;  %v1370_v29 = vrot.slane %v1368_v19, 2  ;;  %v1389_v30 = vrot.slane %v1387_v20, 2 }
 0x192   : > { %v1410_v23 = vrot.slane %v1408_v22, 2  ;;  %v1422_v33 = vrot.slane %v1420_v24, 2  ;;  %v1440_v34 = vsel %vm1439_vm6, %v1438_v25, %v1429_v53 }
 0x193   : > { %v1338_v35 = vadd.f32 %v1336_v27, %v1330_v13  ;;  %v1360_v37 = vadd.f32 %v1358_v28, %v1353_v12  ;;  %v1372_v38 = vadd.f32 %v1370_v29, %v1367_v21  ;;  %v1391_v39 = vadd.f32 %v1389_v30, %v1384_v3 }
 0x194   : > { %v1424_v41 = vadd.f32 %v1422_v33, %v1419_v31  ;;  %v1441_v43 = vsel %vm870_vm1, %v1440_v34, %v1431_v54  ;;  %v1412_v48 = vadd.f32 %v1410_v23, %v1405_v40 }
 0x195   : > { %v1361_v45 = vadd.f32 %v1360_v37, %v1340_v0  ;;  %v1376_v46 = vadd.f32 %v1374_v15, %v1372_v38  ;;  %v1395_v47 = vadd.f32 %v1393_v55, %v1391_v39  ;;  %v1442_v49 = vsel %vm871_vm2, %v1441_v43, %v1433_v42 }
 0x196   : > { %v1342_v50 = vadd.f32 %v1340_v0, %v1338_v35  ;;  %v1428_v51 = vadd.f32 %v1426_v44, %v1424_v41  ;;  %1443 = vst [vmem:[%s719_s18] sm:$0x3f] %v1442_v49  ;;  %v1413_v54 = vadd.f32 %v1412_v48, %v1393_v55 }
 0x197   : > { %v1445_v52 = vrot.slane %v1361_v45, 3  ;;  %v1448_v53 = vrot.slane %v1376_v46, 6  ;;  %v1451_v56 = vrot.slane %v1395_v47, 5 }
 0x198   : > { %v1454_v58 = vrot.slane %v1428_v51, 3 }
 0x199   : > { %v1456_v57 = vsel %vm1435_vm4, %v1342_v50, %v1445_v52 }
 0x19a   : > { %v1457_v36 = vsel %vm1437_vm5, %v1456_v57, %v1448_v53 }
 0x19b   : > { %v1458_v59 = vsel %vm1439_vm6, %v1457_v36, %v1451_v56 }
 0x19c   : > { %v1459_v60 = vsel %vm870_vm1, %v1458_v59, %v1413_v54 }
 0x19d   : > { %v1460_v61 = vsel %vm871_vm2, %v1459_v60, %v1454_v58 }
 0x19e   : > { %1461 = vst [vmem:[%s723_s26] sm:$0x3f] %v1460_v61 }
 0x19f PF: > { %p14_p9 = scmp.ge.s32.totalorder %s1874_s25, 4   ;;  %s2314_s21 = smov %s1813_s22 }
 0x1a0   : > { %s2315_s22 = smov %s1883_s28  ;;  %s2316_s23 = smov %s1874_s25 }
 0x1a1   :  { %16 = sbr.rel (!%p14_p9) target bundleno = 2 (0x2), region = 182 }

</bundles_post_ra>
